<compile_context>
chip_gen: v5e
topology: v5e:2x2
jax: 0.10.0
libtpu: 0.0.40
codegen_flags: <defaults>
</compile_context>

<pallas_src>
import functools
import math

import jax
import jax.numpy as jnp
from jax.experimental import pallas as pl
from jax.experimental.pallas import tpu as pltpu


# -----------------------------------------------------------------------------
# Helpers
# -----------------------------------------------------------------------------
def _pick_tile(dim, preferred, granule):
    """Largest multiple of `granule` that divides `dim` and is <= preferred.

    Falls back to `dim` itself (block == full extent, always legal)."""
    t = min(preferred, dim)
    t = (t // granule) * granule
    while t >= granule:
        if dim % t == 0:
            return t
        t -= granule
    return dim


# -----------------------------------------------------------------------------
# Tiled linear:  y = x @ w + b    (w stored as (in, out))
# -----------------------------------------------------------------------------
def _linear_kernel(x_ref, w_ref, b_ref, o_ref, acc_ref):
    k = pl.program_id(2)

    @pl.when(k == 0)
    def _init():
        # Fold the bias into the accumulator init (added exactly once).
        acc_ref[...] = jnp.broadcast_to(b_ref[...], acc_ref.shape).astype(jnp.float32)

    # bf16 MXU operands, f32 accumulation.
    acc_ref[...] += jnp.dot(x_ref[...].astype(jnp.bfloat16),
                            w_ref[...].astype(jnp.bfloat16),
                            preferred_element_type=jnp.float32)

    @pl.when(k == pl.num_programs(2) - 1)
    def _finalize():
        o_ref[...] = acc_ref[...].astype(o_ref.dtype)


def linear(x2d, w, b, *, tm=512, tn=512, tk=1024):
    """y = x2d @ w + b, tiled (M, N, K) with K-accumulation in VMEM."""
    M, K = x2d.shape
    K2, N = w.shape
    assert K == K2

    tm = _pick_tile(M, tm, 8)      # sublane dim of x / out
    tn = _pick_tile(N, tn, 128)    # lane dim of w / b / out
    tk = _pick_tile(K, tk, 128)    # lane dim of x, sublane dim of w
    grid = (M // tm, N // tn, K // tk)

    return pl.pallas_call(
        _linear_kernel,
        out_shape=jax.ShapeDtypeStruct((M, N), x2d.dtype),
        grid=grid,
        in_specs=[
            pl.BlockSpec((tm, tk), lambda i, j, k: (i, k)),
            pl.BlockSpec((tk, tn), lambda i, j, k: (k, j)),
            pl.BlockSpec((1, tn), lambda i, j, k: (0, j)),
        ],
        out_specs=pl.BlockSpec((tm, tn), lambda i, j, k: (i, j)),
        scratch_shapes=[pltpu.VMEM((tm, tn), jnp.float32)],
        compiler_params=pltpu.CompilerParams(
            dimension_semantics=("parallel", "parallel", "arbitrary"),
            vmem_limit_bytes=48 * 1024 * 1024),
    )(x2d, w, b.reshape(1, N))


# -----------------------------------------------------------------------------
# Flash-style causal attention over the fused QKV buffer
# -----------------------------------------------------------------------------
def _flash_attn_kernel(q_ref, k_ref, v_ref, o_ref, m_scr, l_scr, acc_scr, *,
                       n_head, tq, tk, scale):
    qi = pl.program_id(1)
    kv = pl.program_id(2)
    hs = acc_scr.shape[-1]

    @pl.when(kv == 0)
    def _init():
        m_scr[...] = jnp.full_like(m_scr, -jnp.inf)
        l_scr[...] = jnp.zeros_like(l_scr)
        acc_scr[...] = jnp.zeros_like(acc_scr)

    q_start = qi * tq
    k_start = kv * tk
    visible = k_start < q_start + tq               # tile has >= 1 unmasked entry
    needs_mask = k_start + tk - 1 > q_start        # tile straddles the diagonal

    def update(use_mask):
        q = q_ref[0]          # (tq, C) -- all heads, lane-major
        k = k_ref[0]          # (tk, C)
        v = v_ref[0]          # (tk, C)

        if use_mask:
            # Causal mask from global token indices of this (q, kv) tile pair.
            row = q_start + jax.lax.broadcasted_iota(jnp.int32, (tq, tk), 0)
            col = k_start + jax.lax.broadcasted_iota(jnp.int32, (tq, tk), 1)
            causal = col <= row

        for h in range(n_head):                    # static unroll over heads
            sl = slice(h * hs, (h + 1) * hs)
            qh = q[:, sl].astype(jnp.bfloat16)
            kh = k[:, sl].astype(jnp.bfloat16)
            vh = v[:, sl].astype(jnp.bfloat16)

            # scores: (tq, tk), contraction over head_size (no explicit k^T).
            s = jax.lax.dot_general(
                qh, kh, (((1,), (1,)), ((), ())),
                preferred_element_type=jnp.float32) * scale
            if use_mask:
                s = jnp.where(causal, s, -jnp.inf)

            m_prev = m_scr[h]                      # (tq, 1)
            m_new = jnp.maximum(m_prev, jnp.max(s, axis=-1, keepdims=True))
            alpha = jnp.exp(m_prev - m_new)        # f32 VPU/EUP math
            p = jnp.exp(s - m_new)
            l_scr[h] = alpha * l_scr[h] + jnp.sum(p, axis=-1, keepdims=True)
            acc_scr[h] = alpha * acc_scr[h] + jnp.dot(
                p.astype(jnp.bfloat16), vh, preferred_element_type=jnp.float32)
            m_scr[h] = m_new

    # Tiles straddling the diagonal: build & apply the mask.
    @pl.when(visible & needs_mask)
    def _diag_tile():
        update(use_mask=True)

    # Fully visible interior tiles: no iota/compare/where work at all.
    @pl.when(visible & jnp.logical_not(needs_mask))
    def _interior_tile():
        update(use_mask=False)

    @pl.when(kv == pl.num_programs(2) - 1)
    def _finalize():
        # Assemble all heads into one lane-dense (tq, C) value -> single store.
        pieces = []
        for h in range(n_head):
            inv_l = pl.reciprocal(l_scr[h], approx=False)    # (tq, 1)
            pieces.append(acc_scr[h] * inv_l)
        o_ref[0] = jnp.concatenate(pieces, axis=-1).astype(o_ref.dtype)


def flash_attention(qkv, n_head, *, tq=256, tk=128):
    """qkv: (B, T, 3C) fused c_attn output -> y: (B, T, C) with heads merged.

    Equivalent to: split qkv -> q,k,v; view (B, nh, T, hs); causal
    softmax(q k^T / sqrt(hs)) @ v; merge heads back to (B, T, C)."""
    B, T, three_c = qkv.shape
    C = three_c // 3
    assert C % n_head == 0
    hs = C // n_head

    tq = _pick_tile(T, tq, 8)
    tk = _pick_tile(T, tk, 8)
    nq, nk = T // tq, T // tk
    scale = 1.0 / math.sqrt(hs)

    kernel = functools.partial(_flash_attn_kernel, n_head=n_head, tq=tq, tk=tk,
                               scale=scale)

    def kv_block(qi, kv):
        # Clamp to the last visible kv tile for this q tile: fully-masked grid
        # steps re-request the already-resident block, so Pallas elides their
        # K/V DMAs (their compute is skipped in-kernel via pl.when).
        return jnp.minimum(kv, ((qi + 1) * tq - 1) // tk)

    if C % 128 == 0:
        # Fused path: read q/k/v tiles straight out of (B, T, 3C); the last-dim
        # block index {0, 1, 2} selects the q/k/v column group (no JAX split,
        # no head transpose round-trips through HBM).
        operands = (qkv, qkv, qkv)
        q_spec = pl.BlockSpec((1, tq, C), lambda b, qi, kv: (b, qi, 0))
        k_spec = pl.BlockSpec((1, tk, C), lambda b, qi, kv: (b, kv_block(qi, kv), 1))
        v_spec = pl.BlockSpec((1, tk, C), lambda b, qi, kv: (b, kv_block(qi, kv), 2))
    else:
        # Lane-unfriendly C: split in JAX so the block last dim == full dim.
        q, k, v = jnp.split(qkv, 3, axis=-1)
        operands = (q, k, v)
        q_spec = pl.BlockSpec((1, tq, C), lambda b, qi, kv: (b, qi, 0))
        k_spec = pl.BlockSpec((1, tk, C), lambda b, qi, kv: (b, kv_block(qi, kv), 0))
        v_spec = pl.BlockSpec((1, tk, C), lambda b, qi, kv: (b, kv_block(qi, kv), 0))

    return pl.pallas_call(
        kernel,
        out_shape=jax.ShapeDtypeStruct((B, T, C), qkv.dtype),
        grid=(B, nq, nk),
        in_specs=[q_spec, k_spec, v_spec],
        out_specs=pl.BlockSpec((1, tq, C), lambda b, qi, kv: (b, qi, 0)),
        scratch_shapes=[
            pltpu.VMEM((n_head, tq, 1), jnp.float32),    # running max  m
            pltpu.VMEM((n_head, tq, 1), jnp.float32),    # running sum  l
            pltpu.VMEM((n_head, tq, hs), jnp.float32),   # output accumulator
        ],
        compiler_params=pltpu.CompilerParams(
            dimension_semantics=("parallel", "parallel", "arbitrary")),
    )(*operands)


# -----------------------------------------------------------------------------
# Module wrapper (forward pass of CausalSelfAttention)
# -----------------------------------------------------------------------------
def causal_self_attention(x, params, n_head):
    """Forward pass equivalent to CausalSelfAttention.forward(x)."""
    B, T, C = x.shape
    assert C % n_head == 0

    # c_attn: (B, T, C) -> (B, T, 3C)
    qkv = linear(x.reshape(B * T, C), params["w_attn"], params["b_attn"])
    qkv = qkv.reshape(B, T, 3 * C)

    # fused-head causal flash attention: (B, T, 3C) -> (B, T, C)
    y = flash_attention(qkv, n_head)

    # c_proj: (B, T, C) -> (B, T, C)
    y = linear(y.reshape(B * T, C), params["w_proj"], params["b_proj"])
    return y.reshape(B, T, C)


def init_params(key, n_embd):
    """Deterministic parameter init (shapes match nn.Linear in the module).
    PyTorch Linear weight is (out, in); we store the transposed (in, out) form
    so the kernel computes x @ W^T + b exactly."""
    k1, k2, k3, k4 = jax.random.split(key, 4)
    bound = 1.0 / math.sqrt(n_embd)
    w_attn = jax.random.uniform(k1, (n_embd, 3 * n_embd), jnp.float32, -bound, bound)
    b_attn = jax.random.uniform(k2, (3 * n_embd,), jnp.float32, -bound, bound)
    w_proj = jax.random.uniform(k3, (n_embd, n_embd), jnp.float32, -bound, bound)
    b_proj = jax.random.uniform(k4, (n_embd,), jnp.float32, -bound, bound)
    return {"w_attn": w_attn, "b_attn": b_attn,
            "w_proj": w_proj, "b_proj": b_proj}


def reference_attention(x, params, n_head):
    """Plain-JAX reference identical to the PyTorch module's math."""
    B, T, C = x.shape
    hs = C // n_head
    qkv = x @ params["w_attn"] + params["b_attn"]
    q, k, v = jnp.split(qkv, 3, axis=-1)
    q = q.reshape(B, T, n_head, hs).transpose(0, 2, 1, 3)
    k = k.reshape(B, T, n_head, hs).transpose(0, 2, 1, 3)
    v = v.reshape(B, T, n_head, hs).transpose(0, 2, 1, 3)
    att = (q @ jnp.swapaxes(k, -1, -2)) * (1.0 / math.sqrt(hs))
    mask = jnp.tril(jnp.ones((T, T), dtype=bool))
    att = jnp.where(mask[None, None], att, -jnp.inf)
    att = jax.nn.softmax(att, axis=-1)
    y = (att @ v).transpose(0, 2, 1, 3).reshape(B, T, C)
    return y @ params["w_proj"] + params["b_proj"]


if __name__ == "__main__":
    # Small config consistent with the module (n_embd % n_head == 0).
    # C = 128 (multiple of 128) exercises the fused-QKV BlockSpec path;
    # head_size = 64 matches GPT-2's head size.
    B, T, n_embd, n_head = 2, 128, 128, 2

    key = jax.random.PRNGKey(0)
    k_x, k_p = jax.random.split(key)
    x = jax.random.normal(k_x, (B, T, n_embd), jnp.float32)
    params = init_params(k_p, n_embd)

    y = causal_self_attention(x, params, n_head)
    y = jax.block_until_ready(y)
    assert y.shape == (B, T, n_embd)

    # Numerical check against the plain-JAX reference of the module
    # (tolerance accounts for bf16 MXU operands with f32 accumulation).
    y_ref = reference_attention(x, params, n_head)
    max_err = float(jnp.max(jnp.abs(y - y_ref)))
    assert max_err < 5e-2, f"mismatch vs reference: max_err={max_err}"

    print("KERNEL_OK")
</pallas_src>

<mosaic_0001>
module attributes {stable_mosaic.version = 11 : i64} {
  func.func @_linear_kernel(%arg0: i32, %arg1: i32, %arg2: i32, %arg3: memref<256x128xf32, #tpu.memory_space<vmem>>, %arg4: memref<128x384xf32, #tpu.memory_space<vmem>>, %arg5: memref<1x384xf32, #tpu.memory_space<vmem>>, %arg6: memref<256x384xf32, #tpu.memory_space<vmem>>, %arg7: memref<256x384xf32, #tpu.memory_space<vmem>>) attributes {dimension_semantics = [#tpu.dimension_semantics<parallel>, #tpu.dimension_semantics<parallel>, #tpu.dimension_semantics<arbitrary>], iteration_bounds = array<i64: 1, 1, 1>, scalar_prefetch = 0 : i64, scratch_operands = 1 : i64, tpu.core_type = #tpu.core_type<tc>, window_params = [{transform_indices = @transform_0, window_bounds = array<i64: 256, 128>}, {transform_indices = @transform_1, window_bounds = array<i64: 128, 384>}, {transform_indices = @transform_2, window_bounds = array<i64: 1, 384>}, {transform_indices = @transform_3, window_bounds = array<i64: 256, 384>}]} {
    %c0_i32 = arith.constant 0 : i32
    %0 = arith.cmpi eq, %arg2, %c0_i32 : i32
    %1 = arith.extui %0 : i1 to i32
    %c0_i32_0 = arith.constant 0 : i32
    %2 = arith.cmpi ne, %1, %c0_i32_0 : i32
    scf.if %2 {
      %c0_10 = arith.constant 0 : index
      %c0_11 = arith.constant 0 : index
      %14 = vector.load %arg5[%c0_10, %c0_11] : memref<1x384xf32, #tpu.memory_space<vmem>>, vector<1x384xf32>
      %15 = vector.shape_cast %14 : vector<1x384xf32> to vector<1x384xf32>
      %16 = vector.broadcast %15 : vector<1x384xf32> to vector<256x384xf32>
      %c0_12 = arith.constant 0 : index
      %c0_13 = arith.constant 0 : index
      %17 = vector.load %arg7[%c0_12, %c0_13] : memref<256x384xf32, #tpu.memory_space<vmem>>, vector<256x384xf32>
      tpu.vector_store %arg7[%c0_12, %c0_13], %16 {strides = array<i32>} : memref<256x384xf32, #tpu.memory_space<vmem>>, vector<256x384xf32>,
    } else {
    }
    %c0 = arith.constant 0 : index
    %c0_1 = arith.constant 0 : index
    %3 = vector.load %arg7[%c0, %c0_1] : memref<256x384xf32, #tpu.memory_space<vmem>>, vector<256x384xf32>
    %c0_2 = arith.constant 0 : index
    %c0_3 = arith.constant 0 : index
    %4 = vector.load %arg3[%c0_2, %c0_3] : memref<256x128xf32, #tpu.memory_space<vmem>>, vector<256x128xf32>
    %5 = arith.truncf %4 : vector<256x128xf32> to vector<256x128xbf16>
    %c0_4 = arith.constant 0 : index
    %c0_5 = arith.constant 0 : index
    %6 = vector.load %arg4[%c0_4, %c0_5] : memref<128x384xf32, #tpu.memory_space<vmem>>, vector<128x384xf32>
    %7 = arith.truncf %6 : vector<128x384xf32> to vector<128x384xbf16>
    %cst = arith.constant dense<0.000000e+00> : vector<256x384xf32>
    %8 = tpu.matmul %5, %7, %cst {dimension_numbers = #tpu.dot_dimension_numbers<[1], [0], [0], [1], [0, 0, 1, 1], [], []>} : vector<256x128xbf16>, vector<128x384xbf16>, vector<256x384xf32> -> vector<256x384xf32>
    %9 = arith.addf %3, %8 : vector<256x384xf32>
    %c0_6 = arith.constant 0 : index
    %c0_7 = arith.constant 0 : index
    %10 = vector.load %arg7[%c0_6, %c0_7] : memref<256x384xf32, #tpu.memory_space<vmem>>, vector<256x384xf32>
    tpu.vector_store %arg7[%c0_6, %c0_7], %9 {strides = array<i32>} : memref<256x384xf32, #tpu.memory_space<vmem>>, vector<256x384xf32>,
    %c0_i32_8 = arith.constant 0 : i32
    %11 = arith.cmpi eq, %arg2, %c0_i32_8 : i32
    %12 = arith.extui %11 : i1 to i32
    %c0_i32_9 = arith.constant 0 : i32
    %13 = arith.cmpi ne, %12, %c0_i32_9 : i32
    scf.if %13 {
      %c0_10 = arith.constant 0 : index
      %c0_11 = arith.constant 0 : index
      %14 = vector.load %arg7[%c0_10, %c0_11] : memref<256x384xf32, #tpu.memory_space<vmem>>, vector<256x384xf32>
      %c0_12 = arith.constant 0 : index
      %c0_13 = arith.constant 0 : index
      %15 = vector.load %arg6[%c0_12, %c0_13] : memref<256x384xf32, #tpu.memory_space<vmem>>, vector<256x384xf32>
      tpu.vector_store %arg6[%c0_12, %c0_13], %14 {strides = array<i32>} : memref<256x384xf32, #tpu.memory_space<vmem>>, vector<256x384xf32>,
    } else {
    }
    return
  }
  func.func @transform_0(%arg0: i32, %arg1: i32, %arg2: i32) -> (i32, i32) {
    %c0_i32 = arith.constant 0 : i32
    return %arg0, %arg2 : i32, i32
  }
  func.func @transform_1(%arg0: i32, %arg1: i32, %arg2: i32) -> (i32, i32) {
    %c0_i32 = arith.constant 0 : i32
    return %arg2, %arg1 : i32, i32
  }
  func.func @transform_2(%arg0: i32, %arg1: i32, %arg2: i32) -> (i32, i32) {
    %c0_i32 = arith.constant 0 : i32
    %c0_i32_0 = arith.constant 0 : i32
    return %c0_i32, %arg1 : i32, i32
  }
  func.func @transform_3(%arg0: i32, %arg1: i32, %arg2: i32) -> (i32, i32) {
    %c0_i32 = arith.constant 0 : i32
    return %arg0, %arg1 : i32, i32
  }
}

</mosaic_0001>

<bundles_post_ra>
// kernel: tpu_custom_call.1
= control target key start
LH: loop header
LB: loop body
LE: loop exit
PB: predicated region body
PF: predicated region fallthrough
CT: control target
= control target key end

     0   :  { %8 = vsyncpa [#allocation4], 0  ;;  %s1408_s0 = inlined_call_operand.hbm [shape: f32[256,128], index: 0, kind: input, shape index: {}]   ;;  %s1409_s1 = inlined_call_operand.hbm [shape: f32[128,384], index: 1, kind: input, shape index: {}]   ;;  %s1410_s2 = inlined_call_operand.hbm [shape: f32[1,384], index: 2, kind: input, shape index: {}]   ;;  %s1411_s3 = inlined_call_operand.hbm [shape: f32[256,384], index: 3, kind: output, shape index: {}]  }
   0x1   :  { %9 = vsyncpa [#allocation7], 0  ;;  %s28_s14 = sshll.u32 %s1409_s1, 4  ;;  %s29_s14 = int_to_ptr.hbm [resolvable:$true] %s28_s14 }
   0x2   :  { %10 = vsyncpa [#allocation5], 0  ;;  %s1192_s15 = smov [#allocation6]   ;;  %s15_s19 = sshll.u32 %s1408_s0, 4  ;;  %s16_s19 = int_to_ptr.hbm [resolvable:$true] %s15_s19 }
   0x3   :  { %s30_s16 = sshll.u32 %s1192_s15, 4  ;;  %s1193_s20 = smov 384   ;;  %s31_s16 = int_to_ptr.vmem [resolvable:$true] %s30_s16 }
   0x4   :  { %s1194_s21 = smov 24   ;;  %s1195_s22 = smov [#allocation3]  }
   0x5   :  { %36 = dma.hbm_to_vmem [thread:$0]  %s29_s14, 6144, %s31_s16, [#allocation7], %s1193_s20, %s1193_s20, %s1194_s21  }
   0x6   :  { %s17_s23 = sshll.u32 %s1195_s22, 4  ;;  %s1196_s1 = smov 128   ;;  %s18_s23 = int_to_ptr.vmem [resolvable:$true] %s17_s23 }
   0x7   :  { %s1197_s24 = smov 8   ;;  %s42_s27 = sshll.u32 %s1410_s2, 4  ;;  %s43_s27 = int_to_ptr.hbm [resolvable:$true] %s42_s27 }
   0x8   :  { %23 = dma.hbm_to_vmem [thread:$0]  %s16_s19, 4096, %s18_s23, [#allocation4], %s1196_s1, %s1196_s1, %s1197_s24  }
   0x9   :  { %s1198_s28 = smov [#allocation8]  }
   0xa   :  { %s44_s0 = sshll.u32 %s1198_s28, 4  ;;  %s45_s0 = int_to_ptr.vmem [resolvable:$true] %s44_s0 }
   0xb   :  { %47 = dma.hbm_to_vmem [thread:$0]  %s43_s27, 48, %s45_s0, [#allocation7]  }
   0xc   :  { %1186 = dma.done.wait [#allocation4], 4096  }
   0xd   :  { %1187 = vsyncadd [#allocation4], 4294963200 }
   0xe   :  { %1188 = dma.done.wait [#allocation7], 6192  }
   0xf   :  { %1189 = vsyncadd [#allocation7], 4294961104  ;;  %v354_v0 = vld [vmem:[#allocation6 + $0x150] sm:$0xff]  ;;  %v357_v1 = vld [vmem:[#allocation6 + $0x168] sm:$0xff]  ;;  %s1199_s2 = smov [#allocation9]   ;;  %s1044_s5 = sshll.u32 %s1411_s3, 4  ;;  %s1045_s5 = int_to_ptr.hbm [resolvable:$true] %s1044_s5 }
  0x10   :  { %v355_v2 = vld [vmem:[#allocation6 + $0x158] sm:$0xff]  ;;  %v381_v3 = vpack.c.bf16 %v357_v1, %v354_v0  ;;  %v358_v4 = vld [vmem:[#allocation6 + $0x170] sm:$0xff]  ;;  %v356_v5 = vld [vmem:[#allocation6 + $0x160] sm:$0xff]  ;;  %s1042_s29 = sshll.u32 %s1199_s2, 4  ;;  %s1043_s29 = int_to_ptr.vmem [resolvable:$true] %s1042_s29 }
  0x11   :  { %v359_v6 = vld [vmem:[#allocation6 + $0x178] sm:$0xff]  ;;  %v1232_v7 = vpack.c.bf16 %v358_v4, %v355_v2  ;;  %v348_v9 = vld [vmem:[#allocation6 + $0x120] sm:$0xff]  ;;  %v349_v11 = vld [vmem:[#allocation6 + $0x128] sm:$0xff] }
  0x12   :  { %v1234_v8 = vpack.c.bf16 %v359_v6, %v356_v5  ;;  %v351_v10 = vld [vmem:[#allocation6 + $0x138] sm:$0xff]  ;;  %384 = vmatpush.bf16.msra.mxu0 %v381_v3  ;;  %1058 = vmatpush.bf16.msra.mxu3 %v381_v3  ;;  %v352_v13 = vld [vmem:[#allocation6 + $0x140] sm:$0xff]  ;;  %v350_v14 = vld [vmem:[#allocation6 + $0x130] sm:$0xff] }
  0x13   :  { %v378_v12 = vpack.c.bf16 %v351_v10, %v348_v9  ;;  %v353_v15 = vld [vmem:[#allocation6 + $0x148] sm:$0xff]  ;;  %473 = vmatpush.bf16.msra.mxu1 %v1232_v7  ;;  %v1238_v16 = vpack.c.bf16 %v352_v13, %v349_v11  ;;  %v342_v18 = vld [vmem:[#allocation6 + $0xf0] sm:$0xff]  ;;  %v343_v20 = vld [vmem:[#allocation6 + $0xf8] sm:$0xff] }
  0x14   :  { %562 = vmatpush.bf16.msra.mxu2 %v1234_v8  ;;  %v1240_v17 = vpack.c.bf16 %v353_v15, %v350_v14  ;;  %v345_v19 = vld [vmem:[#allocation6 + $0x108] sm:$0xff]  ;;  %v346_v21 = vld [vmem:[#allocation6 + $0x110] sm:$0xff]  ;;  %v344_v22 = vld [vmem:[#allocation6 + $0x100] sm:$0xff] }
  0x15   :  { %v347_v23 = vld [vmem:[#allocation6 + $0x118] sm:$0xff]  ;;  %v375_v24 = vpack.c.bf16 %v345_v19, %v342_v18  ;;  %v1244_v25 = vpack.c.bf16 %v346_v21, %v343_v20  ;;  %v336_v27 = vld [vmem:[#allocation6 + $0xc0] sm:$0xff]  ;;  %v337_v29 = vld [vmem:[#allocation6 + $0xc8] sm:$0xff] }
  0x16   :  { %385 = vmatpush.bf16.msra.mxu0 %v378_v12  ;;  %1059 = vmatpush.bf16.msra.mxu3 %v378_v12  ;;  %v1246_v26 = vpack.c.bf16 %v347_v23, %v344_v22  ;;  %v339_v28 = vld [vmem:[#allocation6 + $0xd8] sm:$0xff]  ;;  %v340_v30 = vld [vmem:[#allocation6 + $0xe0] sm:$0xff]  ;;  %v338_v31 = vld [vmem:[#allocation6 + $0xd0] sm:$0xff] }
  0x17   :  { %474 = vmatpush.bf16.msra.mxu1 %v1238_v16  ;;  %v341_v32 = vld [vmem:[#allocation6 + $0xe8] sm:$0xff]  ;;  %v372_v33 = vpack.c.bf16 %v339_v28, %v336_v27  ;;  %v1250_v34 = vpack.c.bf16 %v340_v30, %v337_v29  ;;  %v330_v36 = vld [vmem:[#allocation6 + $0x90] sm:$0xff]  ;;  %v331_v38 = vld [vmem:[#allocation6 + $0x98] sm:$0xff] }
  0x18   :  { %563 = vmatpush.bf16.msra.mxu2 %v1240_v17  ;;  %v1252_v35 = vpack.c.bf16 %v341_v32, %v338_v31  ;;  %v333_v37 = vld [vmem:[#allocation6 + $0xa8] sm:$0xff]  ;;  %v334_v39 = vld [vmem:[#allocation6 + $0xb0] sm:$0xff]  ;;  %v332_v40 = vld [vmem:[#allocation6 + $0xa0] sm:$0xff] }
  0x19   :  { %v335_v41 = vld [vmem:[#allocation6 + $0xb8] sm:$0xff]  ;;  %v369_v42 = vpack.c.bf16 %v333_v37, %v330_v36  ;;  %v1256_v43 = vpack.c.bf16 %v334_v39, %v331_v38  ;;  %v324_v45 = vld [vmem:[#allocation6 + $0x60] sm:$0xff]  ;;  %v325_v47 = vld [vmem:[#allocation6 + $0x68] sm:$0xff] }
  0x1a   :  { %386 = vmatpush.bf16.msra.mxu0 %v375_v24  ;;  %1060 = vmatpush.bf16.msra.mxu3 %v375_v24  ;;  %v1258_v44 = vpack.c.bf16 %v335_v41, %v332_v40  ;;  %v327_v46 = vld [vmem:[#allocation6 + $0x78] sm:$0xff]  ;;  %v328_v48 = vld [vmem:[#allocation6 + $0x80] sm:$0xff]  ;;  %v326_v49 = vld [vmem:[#allocation6 + $0x70] sm:$0xff] }
  0x1b   :  { %475 = vmatpush.bf16.msra.mxu1 %v1244_v25  ;;  %v329_v50 = vld [vmem:[#allocation6 + $0x88] sm:$0xff]  ;;  %v366_v51 = vpack.c.bf16 %v327_v46, %v324_v45  ;;  %v367_v52 = vpack.c.bf16 %v328_v48, %v325_v47  ;;  %v318_v54 = vld [vmem:[#allocation6 + $0x30] sm:$0xff]  ;;  %v319_v56 = vld [vmem:[#allocation6 + $0x38] sm:$0xff] }
  0x1c   :  { %564 = vmatpush.bf16.msra.mxu2 %v1246_v26  ;;  %v1262_v53 = vpack.c.bf16 %v329_v50, %v326_v49  ;;  %v321_v55 = vld [vmem:[#allocation6 + $0x48] sm:$0xff]  ;;  %v322_v57 = vld [vmem:[#allocation6 + $0x50] sm:$0xff]  ;;  %v320_v58 = vld [vmem:[#allocation6 + $0x40] sm:$0xff] }
  0x1d   :  { %v323_v59 = vld [vmem:[#allocation6 + $0x58] sm:$0xff]  ;;  %v363_v60 = vpack.c.bf16 %v321_v55, %v318_v54  ;;  %v364_v61 = vpack.c.bf16 %v322_v57, %v319_v56  ;;  %v312_v63 = vld [vmem:[#allocation6] sm:$0xff]  ;;  %v313_v1 = vld [vmem:[#allocation6 + $0x8] sm:$0xff] }
  0x1e   :  { %387 = vmatpush.bf16.msra.mxu0 %v372_v33  ;;  %1061 = vmatpush.bf16.msra.mxu3 %v372_v33  ;;  %v1265_v62 = vpack.c.bf16 %v323_v59, %v320_v58  ;;  %v315_v0 = vld [vmem:[#allocation6 + $0x18] sm:$0xff]  ;;  %v316_v2 = vld [vmem:[#allocation6 + $0x20] sm:$0xff]  ;;  %v314_v3 = vld [vmem:[#allocation6 + $0x10] sm:$0xff] }
  0x1f   :  { %476 = vmatpush.bf16.msra.mxu1 %v1250_v34  ;;  %v317_v4 = vld [vmem:[#allocation6 + $0x28] sm:$0xff]  ;;  %v264_v5 = vld [vmem:[#allocation3] sm:$0xff]  ;;  %v360_v6 = vpack.c.bf16 %v315_v0, %v312_v63  ;;  %v361_v12 = vpack.c.bf16 %v316_v2, %v313_v1  ;;  %v266_v18 = vld [vmem:[#allocation3 + $0x10] sm:$0xff] }
  0x20   :  { %565 = vmatpush.bf16.msra.mxu2 %v1252_v35  ;;  %v265_v9 = vld [vmem:[#allocation3 + $0x8] sm:$0xff]  ;;  %v288_v10 = vld [vmem:[#allocation3 + $0xc0] sm:$0xff]  ;;  %v362_v13 = vpack.c.bf16 %v317_v4, %v314_v3  ;;  %v267_v19 = vld [vmem:[#allocation3 + $0x18] sm:$0xff] }
  0x21   :  { %v289_v11 = vld [vmem:[#allocation3 + $0xc8] sm:$0xff]  ;;  %v296_v14 = vpack.c.bf16 %v265_v9, %v264_v5  ;;  %v290_v20 = vld [vmem:[#allocation3 + $0xd0] sm:$0xff]  ;;  %v291_v21 = vld [vmem:[#allocation3 + $0xd8] sm:$0xff]  ;;  %v297_v22 = vpack.c.bf16 %v267_v19, %v266_v18 }
  0x22   :  { %388 = vmatpush.bf16.msra.mxu0 %v369_v42  ;;  %1062 = vmatpush.bf16.msra.mxu3 %v369_v42  ;;  %v1268_v15 = vpack.c.bf16 %v289_v11, %v288_v10  ;;  %v1275_v23 = vpack.c.bf16 %v291_v21, %v290_v20  ;;  %v292_v24 = vld [vmem:[#allocation3 + $0xe0] sm:$0xff]  ;;  %v270_v29 = vld [vmem:[#allocation3 + $0x30] sm:$0xff]  ;;  %v271_v30 = vld [vmem:[#allocation3 + $0x38] sm:$0xff] }
  0x23   :  { %477 = vmatpush.bf16.msra.mxu1 %v1256_v43  ;;  %v294_v31 = vld [vmem:[#allocation3 + $0xf0] sm:$0xff]  ;;  %v295_v32 = vld [vmem:[#allocation3 + $0xf8] sm:$0xff]  ;;  %v299_v33 = vpack.c.bf16 %v271_v30, %v270_v29  ;;  %v276_v38 = vld [vmem:[#allocation3 + $0x60] sm:$0xff] }
  0x24   :  { %566 = vmatpush.bf16.msra.mxu2 %v1258_v44  ;;  %v275_v36 = vld [vmem:[#allocation3 + $0x58] sm:$0xff]  ;;  %v277_v39 = vld [vmem:[#allocation3 + $0x68] sm:$0xff]  ;;  %v278_v41 = vld [vmem:[#allocation3 + $0x70] sm:$0xff] }
  0x25   :  { %v302_v40 = vpack.c.bf16 %v277_v39, %v276_v38  ;;  %v279_v42 = vld [vmem:[#allocation3 + $0x78] sm:$0xff]  ;;  %v280_v45 = vld [vmem:[#allocation3 + $0x80] sm:$0xff]  ;;  %v281_v46 = vld [vmem:[#allocation3 + $0x88] sm:$0xff] }
  0x26   :  { %389 = vmatpush.bf16.msra.mxu0 %v366_v51  ;;  %1063 = vmatpush.bf16.msra.mxu3 %v366_v51  ;;  %v304_v49 = vpack.c.bf16 %v281_v46, %v280_v45  ;;  %v282_v63 = vld [vmem:[#allocation3 + $0x90] sm:$0xff]  ;;  %v283_v0 = vld [vmem:[#allocation3 + $0x98] sm:$0xff] }
  0x27   :  { %478 = vmatpush.bf16.msra.mxu1 %v367_v52  ;;  %v305_v4 = vpack.c.bf16 %v283_v0, %v282_v63  ;;  %v287_v39 = vld [vmem:[#allocation3 + $0xb8] sm:$0xff] }
  0x28   :  { %567 = vmatpush.bf16.msra.mxu2 %v1262_v53 }
  0x2a   :  { %390 = vmatpush.bf16.msra.mxu0 %v363_v60  ;;  %1064 = vmatpush.bf16.msra.mxu3 %v363_v60 }
  0x2b   :  { %479 = vmatpush.bf16.msra.mxu1 %v364_v61 }
  0x2c   :  { %568 = vmatpush.bf16.msra.mxu2 %v1265_v62 }
  0x2e   :  { %391 = vmatpush.bf16.msra.mxu0 %v360_v6  ;;  %1065 = vmatpush.bf16.msra.mxu3 %v360_v6 }
  0x2f   :  { %480 = vmatpush.bf16.msra.mxu1 %v361_v12 }
  0x30   :  { %569 = vmatpush.bf16.msra.mxu2 %v362_v13 }
  0x31   :  { %392 = vmatmul.bf16.vlgmr.msra.gmra.mxu0 %v296_v14  ;;  %452 = vmatmul.bf16.vlgmr.msra.gmra.mxu3 %v1268_v15 }
  0x32   :  { %1066 = vmatpush.bf16.msrb.mxu3 %v1232_v7  ;;  %481 = vmatmul.bf16.vlgmr.msra.gmra.mxu1 %v296_v14  ;;  %v268_v7 = vld [vmem:[#allocation3 + $0x20] sm:$0xff] }
  0x33   :  { %570 = vmatmul.bf16.vlgmr.msra.gmra.mxu2 %v296_v14 }
  0x36   :  { %1067 = vmatpush.bf16.msrb.mxu3 %v1238_v16  ;;  %v269_v16 = vld [vmem:[#allocation3 + $0x28] sm:$0xff] }
  0x37   :  { %v298_v27 = vpack.c.bf16 %v269_v16, %v268_v7 }
  0x3a   :  { %1068 = vmatpush.bf16.msrb.mxu3 %v1244_v25  ;;  %v293_v25 = vld [vmem:[#allocation3 + $0xe8] sm:$0xff] }
  0x3b   :  { %v1279_v28 = vpack.c.bf16 %v293_v25, %v292_v24 }
  0x3e   :  { %1069 = vmatpush.bf16.msrb.mxu3 %v1250_v34  ;;  %v1286_v34 = vpack.c.bf16 %v295_v32, %v294_v31 }
  0x41   :  { %397 = vmatmul.bf16.gmra.mxu0 %v297_v22  ;;  %457 = vmatmul.bf16.gmra.mxu3 %v1275_v23 }
  0x42   :  { %1070 = vmatpush.bf16.msrb.mxu3 %v1256_v43  ;;  %486 = vmatmul.bf16.gmra.mxu1 %v297_v22  ;;  %v303_v43 = vpack.c.bf16 %v279_v42, %v278_v41 }
  0x43   :  { %575 = vmatmul.bf16.gmra.mxu2 %v297_v22  ;;  %v284_v22 = vld [vmem:[#allocation3 + $0xa0] sm:$0xff] }
  0x46   :  { %1071 = vmatpush.bf16.msrb.mxu3 %v367_v52 }
  0x4a   :  { %1072 = vmatpush.bf16.msrb.mxu3 %v364_v61 }
  0x4e   :  { %1073 = vmatpush.bf16.msrb.mxu3 %v361_v12 }
  0x51   :  { %402 = vmatmul.bf16.gmra.mxu0 %v298_v27  ;;  %462 = vmatmul.bf16.gmra.mxu3 %v1279_v28 }
  0x52   :  { %1074 = vmatpush.bf16.msra.mxu3 %v1234_v8  ;;  %491 = vmatmul.bf16.gmra.mxu1 %v298_v27  ;;  %v272_v8 = vld [vmem:[#allocation3 + $0x40] sm:$0xff] }
  0x53   :  { %580 = vmatmul.bf16.gmra.mxu2 %v298_v27 }
  0x56   :  { %1075 = vmatpush.bf16.msra.mxu3 %v1240_v17  ;;  %v273_v17 = vld [vmem:[#allocation3 + $0x48] sm:$0xff] }
  0x5a   :  { %1076 = vmatpush.bf16.msra.mxu3 %v1246_v26  ;;  %v300_v26 = vpack.c.bf16 %v273_v17, %v272_v8 }
  0x5e   :  { %1077 = vmatpush.bf16.msra.mxu3 %v1252_v35  ;;  %v274_v35 = vld [vmem:[#allocation3 + $0x50] sm:$0xff] }
  0x5f   :  { %v301_v37 = vpack.c.bf16 %v275_v36, %v274_v35 }
  0x61   :  { %407 = vmatmul.bf16.gmra.mxu0 %v299_v33  ;;  %467 = vmatmul.bf16.gmra.mxu3 %v1286_v34 }
  0x62   :  { %1078 = vmatpush.bf16.msra.mxu3 %v1258_v44  ;;  %496 = vmatmul.bf16.gmra.mxu1 %v299_v33  ;;  %v64_v44 = vld [vmem:[#allocation8] sm:$0x7] }
  0x63   :  { %585 = vmatmul.bf16.gmra.mxu2 %v299_v33  ;;  %v1296_v47 = vperm.slane %v64_v44, 0  ;;  %v1298_v48 = vperm.slane %v64_v44, 1  ;;  %v1303_v54 = vperm.slane %v64_v44, 2 }
  0x66   :  { %1079 = vmatpush.bf16.msra.mxu3 %v1262_v53 }
  0x6a   :  { %1080 = vmatpush.bf16.msra.mxu3 %v1265_v62 }
  0x6e   :  { %1081 = vmatpush.bf16.msra.mxu3 %v362_v13 }
  0x71   :  { %412 = vmatmul.bf16.gmra.mxu0 %v300_v26  ;;  %541 = vmatmul.bf16.vlgmr.msrb.gmra.mxu3 %v1268_v15 }
  0x72   :  { %501 = vmatmul.bf16.gmra.mxu1 %v300_v26 }
  0x73   :  { %590 = vmatmul.bf16.gmra.mxu2 %v300_v26 }
  0x81   :  { %417 = vmatmul.bf16.gmra.mxu0 %v301_v37  ;;  %546 = vmatmul.bf16.gmra.mxu3 %v1275_v23 }
  0x82   :  { %506 = vmatmul.bf16.gmra.mxu1 %v301_v37 }
  0x83   :  { %595 = vmatmul.bf16.gmra.mxu2 %v301_v37 }
  0x91   :  { %422 = vmatmul.bf16.gmra.mxu0 %v302_v40  ;;  %551 = vmatmul.bf16.gmra.mxu3 %v1279_v28 }
  0x92   :  { %511 = vmatmul.bf16.gmra.mxu1 %v302_v40 }
  0x93   :  { %600 = vmatmul.bf16.gmra.mxu2 %v302_v40 }
  0xa1   :  { %427 = vmatmul.bf16.gmra.mxu0 %v303_v43  ;;  %556 = vmatmul.bf16.gmra.mxu3 %v1286_v34 }
  0xa2   :  { %516 = vmatmul.bf16.gmra.mxu1 %v303_v43 }
  0xa3   :  { %605 = vmatmul.bf16.gmra.mxu2 %v303_v43 }
  0xae   :  { %v393_v50 = vpop.f32.mrf.mxu0 }
  0xaf   :  { %v651_v51 = vadd.f32 %v393_v50, %v1296_v47  ;;  %v482_v52 = vpop.f32.mrf.mxu1 }
  0xb0   :  { %v652_v53 = vadd.f32 %v482_v52, %v1298_v48 }
  0xb1   :  { %942 = vst [vmem:[#allocation9] sm:$0xff] %v651_v51  ;;  %432 = vmatmul.bf16.gmra.mxu0 %v304_v49  ;;  %630 = vmatmul.bf16.vlgmr.msra.gmra.mxu3 %v1268_v15 }
  0xb2   :  { %943 = vst [vmem:[#allocation9 + $0x8] sm:$0xff] %v652_v53  ;;  %521 = vmatmul.bf16.gmra.mxu1 %v304_v49 }
  0xb3   :  { %610 = vmatmul.bf16.gmra.mxu2 %v304_v49 }
  0xb4   :  { %v453_v55 = vpop.f32.mrf.mxu3 }
  0xb5   :  { %v723_v56 = vadd.f32 %v453_v55, %v1296_v47 }
  0xb6   :  { %v571_v57 = vpop.f32.mrf.mxu2  ;;  %v395_v59 = vpop.f32.mrf.mxu0 }
  0xb7   :  { %v653_v58 = vadd.f32 %v571_v57, %v1303_v54  ;;  %1014 = vst [vmem:[#allocation9 + $0x240] sm:$0xff] %v723_v56  ;;  %v654_v60 = vadd.f32 %v395_v59, %v1296_v47  ;;  %v484_v61 = vpop.f32.mrf.mxu1 }
  0xb8   :  { %v655_v62 = vadd.f32 %v484_v61, %v1298_v48 }
  0xb9   :  { %944 = vst [vmem:[#allocation9 + $0x10] sm:$0xff] %v653_v58 }
  0xba   :  { %945 = vst [vmem:[#allocation9 + $0x18] sm:$0xff] %v654_v60 }
  0xbb   :  { %946 = vst [vmem:[#allocation9 + $0x20] sm:$0xff] %v655_v62 }
  0xbc   :  { %v455_v1 = vpop.f32.mrf.mxu3 }
  0xbd   :  { %v726_v2 = vadd.f32 %v455_v1, %v1296_v47 }
  0xbe   :  { %v573_v3 = vpop.f32.mrf.mxu2  ;;  %v398_v6 = vpop.f32.mrf.mxu0 }
  0xbf   :  { %v656_v5 = vadd.f32 %v573_v3, %v1303_v54  ;;  %1017 = vst [vmem:[#allocation9 + $0x258] sm:$0xff] %v726_v2  ;;  %v657_v9 = vadd.f32 %v398_v6, %v1296_v47  ;;  %v487_v10 = vpop.f32.mrf.mxu1 }
  0xc0   :  { %v658_v11 = vadd.f32 %v487_v10, %v1298_v48 }
  0xc1   :  { %947 = vst [vmem:[#allocation9 + $0x28] sm:$0xff] %v656_v5  ;;  %437 = vmatmul.bf16.gmra.mxu0 %v305_v4  ;;  %635 = vmatmul.bf16.gmra.mxu3 %v1275_v23  ;;  %v285_v23 = vld [vmem:[#allocation3 + $0xa8] sm:$0xff] }
  0xc2   :  { %948 = vst [vmem:[#allocation9 + $0x30] sm:$0xff] %v657_v9  ;;  %526 = vmatmul.bf16.gmra.mxu1 %v305_v4  ;;  %v306_v25 = vpack.c.bf16 %v285_v23, %v284_v22 }
  0xc3   :  { %949 = vst [vmem:[#allocation9 + $0x38] sm:$0xff] %v658_v11  ;;  %615 = vmatmul.bf16.gmra.mxu2 %v305_v4 }
  0xc4   :  { %v458_v12 = vpop.f32.mrf.mxu3 }
  0xc5   :  { %v729_v13 = vadd.f32 %v458_v12, %v1296_v47 }
  0xc6   :  { %v576_v14 = vpop.f32.mrf.mxu2  ;;  %v400_v18 = vpop.f32.mrf.mxu0 }
  0xc7   :  { %v659_v15 = vadd.f32 %v576_v14, %v1303_v54  ;;  %1020 = vst [vmem:[#allocation9 + $0x270] sm:$0xff] %v729_v13  ;;  %v660_v19 = vadd.f32 %v400_v18, %v1296_v47  ;;  %v489_v20 = vpop.f32.mrf.mxu1 }
  0xc8   :  { %v661_v21 = vadd.f32 %v489_v20, %v1298_v48 }
  0xc9   :  { %950 = vst [vmem:[#allocation9 + $0x40] sm:$0xff] %v659_v15 }
  0xca   :  { %951 = vst [vmem:[#allocation9 + $0x48] sm:$0xff] %v660_v19 }
  0xcb   :  { %952 = vst [vmem:[#allocation9 + $0x50] sm:$0xff] %v661_v21 }
  0xcc   :  { %v460_v7 = vpop.f32.mrf.mxu3 }
  0xcd   :  { %v732_v16 = vadd.f32 %v460_v7, %v1296_v47 }
  0xce   :  { %v578_v24 = vpop.f32.mrf.mxu2  ;;  %v403_v29 = vpop.f32.mrf.mxu0 }
  0xcf   :  { %v662_v27 = vadd.f32 %v578_v24, %v1303_v54  ;;  %1023 = vst [vmem:[#allocation9 + $0x288] sm:$0xff] %v732_v16  ;;  %v663_v30 = vadd.f32 %v403_v29, %v1296_v47  ;;  %v492_v31 = vpop.f32.mrf.mxu1 }
  0xd0   :  { %v664_v32 = vadd.f32 %v492_v31, %v1298_v48 }
  0xd1   :  { %953 = vst [vmem:[#allocation9 + $0x58] sm:$0xff] %v662_v27  ;;  %442 = vmatmul.bf16.gmra.mxu0 %v306_v25  ;;  %640 = vmatmul.bf16.gmra.mxu3 %v1279_v28  ;;  %v286_v28 = vld [vmem:[#allocation3 + $0xb0] sm:$0xff] }
  0xd2   :  { %954 = vst [vmem:[#allocation9 + $0x60] sm:$0xff] %v663_v30  ;;  %531 = vmatmul.bf16.gmra.mxu1 %v306_v25  ;;  %v307_v43 = vpack.c.bf16 %v287_v39, %v286_v28 }
  0xd3   :  { %955 = vst [vmem:[#allocation9 + $0x68] sm:$0xff] %v664_v32  ;;  %620 = vmatmul.bf16.gmra.mxu2 %v306_v25 }
  0xd4   :  { %v463_v33 = vpop.f32.mrf.mxu3 }
  0xd5   :  { %v735_v8 = vadd.f32 %v463_v33, %v1296_v47 }
  0xd6   :  { %v581_v17 = vpop.f32.mrf.mxu2  ;;  %v405_v35 = vpop.f32.mrf.mxu0 }
  0xd7   :  { %v665_v26 = vadd.f32 %v581_v17, %v1303_v54  ;;  %1026 = vst [vmem:[#allocation9 + $0x2a0] sm:$0xff] %v735_v8  ;;  %v666_v36 = vadd.f32 %v405_v35, %v1296_v47  ;;  %v494_v37 = vpop.f32.mrf.mxu1 }
  0xd8   :  { %v667_v38 = vadd.f32 %v494_v37, %v1298_v48 }
  0xd9   :  { %956 = vst [vmem:[#allocation9 + $0x70] sm:$0xff] %v665_v26 }
  0xda   :  { %957 = vst [vmem:[#allocation9 + $0x78] sm:$0xff] %v666_v36 }
  0xdb   :  { %958 = vst [vmem:[#allocation9 + $0x80] sm:$0xff] %v667_v38 }
  0xdc   :  { %v465_v40 = vpop.f32.mrf.mxu3 }
  0xdd   :  { %v738_v41 = vadd.f32 %v465_v40, %v1296_v47 }
  0xde   :  { %v583_v42 = vpop.f32.mrf.mxu2  ;;  %v408_v45 = vpop.f32.mrf.mxu0 }
  0xdf   :  { %v668_v44 = vadd.f32 %v583_v42, %v1303_v54  ;;  %1029 = vst [vmem:[#allocation9 + $0x2b8] sm:$0xff] %v738_v41  ;;  %v669_v46 = vadd.f32 %v408_v45, %v1296_v47  ;;  %v497_v49 = vpop.f32.mrf.mxu1 }
  0xe0   :  { %v670_v50 = vadd.f32 %v497_v49, %v1298_v48 }
  0xe1   :  { %959 = vst [vmem:[#allocation9 + $0x88] sm:$0xff] %v668_v44  ;;  %447 = vmatmul.bf16.gmra.mxu0 %v307_v43  ;;  %645 = vmatmul.bf16.gmra.mxu3 %v1286_v34 }
  0xe2   :  { %960 = vst [vmem:[#allocation9 + $0x90] sm:$0xff] %v669_v46  ;;  %536 = vmatmul.bf16.gmra.mxu1 %v307_v43 }
  0xe3   :  { %961 = vst [vmem:[#allocation9 + $0x98] sm:$0xff] %v670_v50  ;;  %625 = vmatmul.bf16.gmra.mxu2 %v307_v43 }
  0xe4   :  { %v468_v51 = vpop.f32.mrf.mxu3 }
  0xe5   :  { %v741_v52 = vadd.f32 %v468_v51, %v1296_v47 }
  0xe6   :  { %v586_v53 = vpop.f32.mrf.mxu2  ;;  %v410_v56 = vpop.f32.mrf.mxu0 }
  0xe7   :  { %v671_v55 = vadd.f32 %v586_v53, %v1303_v54  ;;  %1032 = vst [vmem:[#allocation9 + $0x2d0] sm:$0xff] %v741_v52  ;;  %v672_v57 = vadd.f32 %v410_v56, %v1296_v47  ;;  %v499_v58 = vpop.f32.mrf.mxu1 }
  0xe8   :  { %v673_v59 = vadd.f32 %v499_v58, %v1298_v48 }
  0xe9   :  { %962 = vst [vmem:[#allocation9 + $0xa0] sm:$0xff] %v671_v55 }
  0xea   :  { %963 = vst [vmem:[#allocation9 + $0xa8] sm:$0xff] %v672_v57 }
  0xeb   :  { %964 = vst [vmem:[#allocation9 + $0xb0] sm:$0xff] %v673_v59 }
  0xec   :  { %v470_v34 = vpop.f32.mrf.mxu3 }
  0xed   :  { %v744_v60 = vadd.f32 %v470_v34, %v1296_v47 }
  0xee   :  { %v588_v61 = vpop.f32.mrf.mxu2  ;;  %v413_v63 = vpop.f32.mrf.mxu0 }
  0xef   :  { %v674_v62 = vadd.f32 %v588_v61, %v1303_v54  ;;  %1035 = vst [vmem:[#allocation9 + $0x2e8] sm:$0xff] %v744_v60  ;;  %v675_v0 = vadd.f32 %v413_v63, %v1296_v47  ;;  %v502_v1 = vpop.f32.mrf.mxu1 }
  0xf0   :  { %v676_v2 = vadd.f32 %v502_v1, %v1298_v48 }
  0xf1   :  { %965 = vst [vmem:[#allocation9 + $0xb8] sm:$0xff] %v674_v62 }
  0xf2   :  { %966 = vst [vmem:[#allocation9 + $0xc0] sm:$0xff] %v675_v0 }
  0xf3   :  { %967 = vst [vmem:[#allocation9 + $0xc8] sm:$0xff] %v676_v2 }
  0xf4   :  { %v542_v3 = vpop.f32.mrf.mxu3 }
  0xf5   :  { %v724_v4 = vadd.f32 %v542_v3, %v1298_v48 }
  0xf6   :  { %v591_v5 = vpop.f32.mrf.mxu2  ;;  %v415_v9 = vpop.f32.mrf.mxu0 }
  0xf7   :  { %v677_v6 = vadd.f32 %v591_v5, %v1303_v54  ;;  %1015 = vst [vmem:[#allocation9 + $0x248] sm:$0xff] %v724_v4  ;;  %v678_v10 = vadd.f32 %v415_v9, %v1296_v47  ;;  %v504_v11 = vpop.f32.mrf.mxu1 }
  0xf8   :  { %v679_v12 = vadd.f32 %v504_v11, %v1298_v48 }
  0xf9   :  { %968 = vst [vmem:[#allocation9 + $0xd0] sm:$0xff] %v677_v6 }
  0xfa   :  { %969 = vst [vmem:[#allocation9 + $0xd8] sm:$0xff] %v678_v10 }
  0xfb   :  { %970 = vst [vmem:[#allocation9 + $0xe0] sm:$0xff] %v679_v12 }
  0xfc   :  { %v544_v13 = vpop.f32.mrf.mxu3 }
  0xfd   :  { %v727_v14 = vadd.f32 %v544_v13, %v1298_v48 }
  0xfe   :  { %v593_v15 = vpop.f32.mrf.mxu2  ;;  %v418_v19 = vpop.f32.mrf.mxu0 }
  0xff   :  { %v680_v18 = vadd.f32 %v593_v15, %v1303_v54  ;;  %1018 = vst [vmem:[#allocation9 + $0x260] sm:$0xff] %v727_v14  ;;  %v681_v20 = vadd.f32 %v418_v19, %v1296_v47  ;;  %v507_v21 = vpop.f32.mrf.mxu1 }
 0x100   :  { %v682_v22 = vadd.f32 %v507_v21, %v1298_v48 }
 0x101   :  { %971 = vst [vmem:[#allocation9 + $0xe8] sm:$0xff] %v680_v18 }
 0x102   :  { %972 = vst [vmem:[#allocation9 + $0xf0] sm:$0xff] %v681_v20 }
 0x103   :  { %973 = vst [vmem:[#allocation9 + $0xf8] sm:$0xff] %v682_v22 }
 0x104   :  { %v547_v23 = vpop.f32.mrf.mxu3 }
 0x105   :  { %v730_v7 = vadd.f32 %v547_v23, %v1298_v48 }
 0x106   :  { %v596_v16 = vpop.f32.mrf.mxu2  ;;  %v420_v25 = vpop.f32.mrf.mxu0 }
 0x107   :  { %v683_v24 = vadd.f32 %v596_v16, %v1303_v54  ;;  %1021 = vst [vmem:[#allocation9 + $0x278] sm:$0xff] %v730_v7  ;;  %v684_v27 = vadd.f32 %v420_v25, %v1296_v47  ;;  %v509_v29 = vpop.f32.mrf.mxu1 }
 0x108   :  { %v685_v30 = vadd.f32 %v509_v29, %v1298_v48 }
 0x109   :  { %974 = vst [vmem:[#allocation9 + $0x100] sm:$0xff] %v683_v24 }
 0x10a   :  { %975 = vst [vmem:[#allocation9 + $0x108] sm:$0xff] %v684_v27 }
 0x10b   :  { %976 = vst [vmem:[#allocation9 + $0x110] sm:$0xff] %v685_v30 }
 0x10c   :  { %v549_v31 = vpop.f32.mrf.mxu3 }
 0x10d   :  { %v733_v32 = vadd.f32 %v549_v31, %v1298_v48 }
 0x10e   :  { %v598_v33 = vpop.f32.mrf.mxu2  ;;  %v423_v17 = vpop.f32.mrf.mxu0 }
 0x10f   :  { %v686_v8 = vadd.f32 %v598_v33, %v1303_v54  ;;  %1024 = vst [vmem:[#allocation9 + $0x290] sm:$0xff] %v733_v32  ;;  %v687_v26 = vadd.f32 %v423_v17, %v1296_v47  ;;  %v512_v35 = vpop.f32.mrf.mxu1 }
 0x110   :  { %v688_v36 = vadd.f32 %v512_v35, %v1298_v48 }
 0x111   :  { %977 = vst [vmem:[#allocation9 + $0x118] sm:$0xff] %v686_v8 }
 0x112   :  { %978 = vst [vmem:[#allocation9 + $0x120] sm:$0xff] %v687_v26 }
 0x113   :  { %979 = vst [vmem:[#allocation9 + $0x128] sm:$0xff] %v688_v36 }
 0x114   :  { %v552_v37 = vpop.f32.mrf.mxu3 }
 0x115   :  { %v736_v38 = vadd.f32 %v552_v37, %v1298_v48 }
 0x116   :  { %v601_v28 = vpop.f32.mrf.mxu2  ;;  %v425_v40 = vpop.f32.mrf.mxu0 }
 0x117   :  { %v689_v39 = vadd.f32 %v601_v28, %v1303_v54  ;;  %1027 = vst [vmem:[#allocation9 + $0x2a8] sm:$0xff] %v736_v38  ;;  %v690_v41 = vadd.f32 %v425_v40, %v1296_v47  ;;  %v514_v42 = vpop.f32.mrf.mxu1 }
 0x118   :  { %v691_v43 = vadd.f32 %v514_v42, %v1298_v48 }
 0x119   :  { %980 = vst [vmem:[#allocation9 + $0x130] sm:$0xff] %v689_v39 }
 0x11a   :  { %981 = vst [vmem:[#allocation9 + $0x138] sm:$0xff] %v690_v41 }
 0x11b   :  { %982 = vst [vmem:[#allocation9 + $0x140] sm:$0xff] %v691_v43 }
 0x11c   :  { %v554_v44 = vpop.f32.mrf.mxu3 }
 0x11d   :  { %v739_v45 = vadd.f32 %v554_v44, %v1298_v48 }
 0x11e   :  { %v603_v46 = vpop.f32.mrf.mxu2  ;;  %v428_v50 = vpop.f32.mrf.mxu0 }
 0x11f   :  { %v692_v49 = vadd.f32 %v603_v46, %v1303_v54  ;;  %1030 = vst [vmem:[#allocation9 + $0x2c0] sm:$0xff] %v739_v45  ;;  %v693_v51 = vadd.f32 %v428_v50, %v1296_v47  ;;  %v517_v52 = vpop.f32.mrf.mxu1 }
 0x120   :  { %v694_v53 = vadd.f32 %v517_v52, %v1298_v48 }
 0x121   :  { %983 = vst [vmem:[#allocation9 + $0x148] sm:$0xff] %v692_v49 }
 0x122   :  { %984 = vst [vmem:[#allocation9 + $0x150] sm:$0xff] %v693_v51 }
 0x123   :  { %985 = vst [vmem:[#allocation9 + $0x158] sm:$0xff] %v694_v53 }
 0x124   :  { %v557_v55 = vpop.f32.mrf.mxu3 }
 0x125   :  { %v742_v56 = vadd.f32 %v557_v55, %v1298_v48 }
 0x126   :  { %v606_v57 = vpop.f32.mrf.mxu2  ;;  %v430_v59 = vpop.f32.mrf.mxu0 }
 0x127   :  { %v695_v58 = vadd.f32 %v606_v57, %v1303_v54  ;;  %1033 = vst [vmem:[#allocation9 + $0x2d8] sm:$0xff] %v742_v56  ;;  %v696_v34 = vadd.f32 %v430_v59, %v1296_v47  ;;  %v519_v60 = vpop.f32.mrf.mxu1 }
 0x128   :  { %v697_v61 = vadd.f32 %v519_v60, %v1298_v48 }
 0x129   :  { %986 = vst [vmem:[#allocation9 + $0x160] sm:$0xff] %v695_v58 }
 0x12a   :  { %987 = vst [vmem:[#allocation9 + $0x168] sm:$0xff] %v696_v34 }
 0x12b   :  { %988 = vst [vmem:[#allocation9 + $0x170] sm:$0xff] %v697_v61 }
 0x12c   :  { %v559_v62 = vpop.f32.mrf.mxu3 }
 0x12d   :  { %v745_v63 = vadd.f32 %v559_v62, %v1298_v48 }
 0x12e   :  { %v608_v0 = vpop.f32.mrf.mxu2  ;;  %v433_v2 = vpop.f32.mrf.mxu0 }
 0x12f   :  { %v698_v1 = vadd.f32 %v608_v0, %v1303_v54  ;;  %1036 = vst [vmem:[#allocation9 + $0x2f0] sm:$0xff] %v745_v63  ;;  %v699_v3 = vadd.f32 %v433_v2, %v1296_v47  ;;  %v522_v4 = vpop.f32.mrf.mxu1 }
 0x130   :  { %v700_v5 = vadd.f32 %v522_v4, %v1298_v48 }
 0x131   :  { %989 = vst [vmem:[#allocation9 + $0x178] sm:$0xff] %v698_v1 }
 0x132   :  { %990 = vst [vmem:[#allocation9 + $0x180] sm:$0xff] %v699_v3 }
 0x133   :  { %991 = vst [vmem:[#allocation9 + $0x188] sm:$0xff] %v700_v5 }
 0x134   :  { %v631_v6 = vpop.f32.mrf.mxu3 }
 0x135   :  { %v725_v10 = vadd.f32 %v631_v6, %v1303_v54 }
 0x136   :  { %v611_v9 = vpop.f32.mrf.mxu2  ;;  %v435_v12 = vpop.f32.mrf.mxu0 }
 0x137   :  { %v701_v11 = vadd.f32 %v611_v9, %v1303_v54  ;;  %1016 = vst [vmem:[#allocation9 + $0x250] sm:$0xff] %v725_v10  ;;  %v702_v13 = vadd.f32 %v435_v12, %v1296_v47  ;;  %v524_v14 = vpop.f32.mrf.mxu1 }
 0x138   :  { %v703_v15 = vadd.f32 %v524_v14, %v1298_v48 }
 0x139   :  { %992 = vst [vmem:[#allocation9 + $0x190] sm:$0xff] %v701_v11 }
 0x13a   :  { %993 = vst [vmem:[#allocation9 + $0x198] sm:$0xff] %v702_v13 }
 0x13b   :  { %994 = vst [vmem:[#allocation9 + $0x1a0] sm:$0xff] %v703_v15 }
 0x13c   :  { %v633_v18 = vpop.f32.mrf.mxu3 }
 0x13d   :  { %v728_v20 = vadd.f32 %v633_v18, %v1303_v54 }
 0x13e   :  { %v613_v19 = vpop.f32.mrf.mxu2  ;;  %v438_v22 = vpop.f32.mrf.mxu0 }
 0x13f   :  { %v704_v21 = vadd.f32 %v613_v19, %v1303_v54  ;;  %1019 = vst [vmem:[#allocation9 + $0x268] sm:$0xff] %v728_v20  ;;  %v705_v23 = vadd.f32 %v438_v22, %v1296_v47  ;;  %v527_v7 = vpop.f32.mrf.mxu1 }
 0x140   :  { %v706_v16 = vadd.f32 %v527_v7, %v1298_v48 }
 0x141   :  { %995 = vst [vmem:[#allocation9 + $0x1a8] sm:$0xff] %v704_v21 }
 0x142   :  { %996 = vst [vmem:[#allocation9 + $0x1b0] sm:$0xff] %v705_v23 }
 0x143   :  { %997 = vst [vmem:[#allocation9 + $0x1b8] sm:$0xff] %v706_v16 }
 0x144   :  { %v636_v24 = vpop.f32.mrf.mxu3 }
 0x145   :  { %v731_v27 = vadd.f32 %v636_v24, %v1303_v54 }
 0x146   :  { %v616_v25 = vpop.f32.mrf.mxu2  ;;  %v440_v30 = vpop.f32.mrf.mxu0 }
 0x147   :  { %v707_v29 = vadd.f32 %v616_v25, %v1303_v54  ;;  %1022 = vst [vmem:[#allocation9 + $0x280] sm:$0xff] %v731_v27  ;;  %v708_v31 = vadd.f32 %v440_v30, %v1296_v47  ;;  %v529_v32 = vpop.f32.mrf.mxu1 }
 0x148   :  { %v709_v33 = vadd.f32 %v529_v32, %v1298_v48 }
 0x149   :  { %998 = vst [vmem:[#allocation9 + $0x1c0] sm:$0xff] %v707_v29 }
 0x14a   :  { %999 = vst [vmem:[#allocation9 + $0x1c8] sm:$0xff] %v708_v31 }
 0x14b   :  { %1000 = vst [vmem:[#allocation9 + $0x1d0] sm:$0xff] %v709_v33 }
 0x14c   :  { %v638_v8 = vpop.f32.mrf.mxu3 }
 0x14d   :  { %v734_v26 = vadd.f32 %v638_v8, %v1303_v54 }
 0x14e   :  { %v618_v17 = vpop.f32.mrf.mxu2  ;;  %v443_v36 = vpop.f32.mrf.mxu0 }
 0x14f   :  { %v710_v35 = vadd.f32 %v618_v17, %v1303_v54  ;;  %1025 = vst [vmem:[#allocation9 + $0x298] sm:$0xff] %v734_v26  ;;  %v711_v37 = vadd.f32 %v443_v36, %v1296_v47  ;;  %v532_v38 = vpop.f32.mrf.mxu1 }
 0x150   :  { %v712_v28 = vadd.f32 %v532_v38, %v1298_v48 }
 0x151   :  { %1001 = vst [vmem:[#allocation9 + $0x1d8] sm:$0xff] %v710_v35 }
 0x152   :  { %1002 = vst [vmem:[#allocation9 + $0x1e0] sm:$0xff] %v711_v37 }
 0x153   :  { %1003 = vst [vmem:[#allocation9 + $0x1e8] sm:$0xff] %v712_v28 }
 0x154   :  { %v641_v39 = vpop.f32.mrf.mxu3 }
 0x155   :  { %v737_v41 = vadd.f32 %v641_v39, %v1303_v54 }
 0x156   :  { %v621_v40 = vpop.f32.mrf.mxu2  ;;  %v445_v43 = vpop.f32.mrf.mxu0 }
 0x157   :  { %v713_v42 = vadd.f32 %v621_v40, %v1303_v54  ;;  %1028 = vst [vmem:[#allocation9 + $0x2b0] sm:$0xff] %v737_v41  ;;  %v714_v44 = vadd.f32 %v445_v43, %v1296_v47  ;;  %v534_v45 = vpop.f32.mrf.mxu1 }
 0x158   :  { %v715_v46 = vadd.f32 %v534_v45, %v1298_v48 }
 0x159   :  { %1004 = vst [vmem:[#allocation9 + $0x1f0] sm:$0xff] %v713_v42 }
 0x15a   :  { %1005 = vst [vmem:[#allocation9 + $0x1f8] sm:$0xff] %v714_v44 }
 0x15b   :  { %1006 = vst [vmem:[#allocation9 + $0x200] sm:$0xff] %v715_v46 }
 0x15c   :  { %v643_v49 = vpop.f32.mrf.mxu3 }
 0x15d   :  { %v740_v51 = vadd.f32 %v643_v49, %v1303_v54 }
 0x15e   :  { %v623_v50 = vpop.f32.mrf.mxu2  ;;  %v448_v53 = vpop.f32.mrf.mxu0 }
 0x15f   :  { %v716_v52 = vadd.f32 %v623_v50, %v1303_v54  ;;  %1031 = vst [vmem:[#allocation9 + $0x2c8] sm:$0xff] %v740_v51  ;;  %v717_v55 = vadd.f32 %v448_v53, %v1296_v47  ;;  %v537_v56 = vpop.f32.mrf.mxu1 }
 0x160   :  { %v718_v57 = vadd.f32 %v537_v56, %v1298_v48 }
 0x161   :  { %1007 = vst [vmem:[#allocation9 + $0x208] sm:$0xff] %v716_v52 }
 0x162   :  { %1008 = vst [vmem:[#allocation9 + $0x210] sm:$0xff] %v717_v55 }
 0x163   :  { %1009 = vst [vmem:[#allocation9 + $0x218] sm:$0xff] %v718_v57 }
 0x164   :  { %v646_v58 = vpop.f32.mrf.mxu3 }
 0x165   :  { %v743_v34 = vadd.f32 %v646_v58, %v1303_v54 }
 0x166   :  { %v626_v59 = vpop.f32.mrf.mxu2  ;;  %v450_v61 = vpop.f32.mrf.mxu0 }
 0x167   :  { %v719_v60 = vadd.f32 %v626_v59, %v1303_v54  ;;  %1034 = vst [vmem:[#allocation9 + $0x2e0] sm:$0xff] %v743_v34  ;;  %v720_v62 = vadd.f32 %v450_v61, %v1296_v47  ;;  %v539_v63 = vpop.f32.mrf.mxu1 }
 0x168   :  { %v721_v0 = vadd.f32 %v539_v63, %v1298_v48 }
 0x169   :  { %1010 = vst [vmem:[#allocation9 + $0x220] sm:$0xff] %v719_v60 }
 0x16a   :  { %1011 = vst [vmem:[#allocation9 + $0x228] sm:$0xff] %v720_v62 }
 0x16b   :  { %1012 = vst [vmem:[#allocation9 + $0x230] sm:$0xff] %v721_v0 }
 0x16c   :  { %v648_v1 = vpop.f32.mrf.mxu3 }
 0x16d   :  { %v746_v3 = vadd.f32 %v648_v1, %v1303_v54 }
 0x16e   :  { %v628_v2 = vpop.f32.mrf.mxu2 }
 0x16f   :  { %v722_v4 = vadd.f32 %v628_v2, %v1303_v54  ;;  %1037 = vst [vmem:[#allocation9 + $0x2f8] sm:$0xff] %v746_v3 }
 0x171   :  { %1013 = vst [vmem:[#allocation9 + $0x238] sm:$0xff] %v722_v4 }
 0x172   :  { %1050 = dma.vmem_to_hbm [thread:$0]  %s1043_s29, 12288, %s1045_s5, [#allocation5], %s1193_s20, %s1193_s20, %s1194_s21  }
 0x173   :  { %1190 = dma.done.wait [#allocation5], 12288  }
 0x174   :  { %1191 = vsyncadd [#allocation5], 4294955008 }
 0x175   :  { %1055 = vsyncpa [#allocation4], 1 }
 0x176   :  { %1056 = vsyncpa [#allocation7], 1 }
 0x177   :  { %1057 = vsyncpa [#allocation5], 1 }

</bundles_post_ra>
